<compile_context>
chip_gen: v6e
topology: v6e:2x2x1
jax: 0.10.0
libtpu: 0.0.40
codegen_flags: <defaults>
</compile_context>

<pallas_src>
import functools
import math

import jax
import jax.numpy as jnp
import numpy as np
from jax.experimental import pallas as pl
from jax.experimental.pallas import tpu as pltpu


def _round_up(x, m):
    return (x + m - 1) // m * m


def _pick_div(total, target, align):
    """Largest multiple of `align` <= target that divides `total`.
    `total` must itself be a multiple of `align`."""
    t = max(align, min(target, total))
    t = (t // align) * align
    while total % t:
        t -= align
    return t


# ---------------------------------------------------------------------------
# Kernel 1: tiled linear  y = x @ W_t   (W_t prepared once in (K, N) layout)
# ---------------------------------------------------------------------------
def _matmul_kernel(compute_dtype, x_ref, w_ref, o_ref, acc_ref):
    @pl.when(pl.program_id(2) == 0)
    def _():
        acc_ref[...] = jnp.zeros_like(acc_ref)

    acc_ref[...] += jnp.dot(x_ref[...].astype(compute_dtype),
                            w_ref[...].astype(compute_dtype),
                            preferred_element_type=jnp.float32)

    @pl.when(pl.program_id(2) == pl.num_programs(2) - 1)
    def _():
        o_ref[...] = acc_ref[...].astype(o_ref.dtype)


def prepare_linear_params(p, lora_config=None):
    """One-time prep (hoisted off the hot path): merge the LoRA delta into the
    weight, transpose to (K, N) for a canonical MXU contraction, and zero-pad
    the contraction / output dims to multiples of 128."""
    w = p['weight']                                      # (N, K) PyTorch layout
    if lora_config is not None and 'lora_A' in p:
        delta = p['lora_B'].astype(jnp.float32) @ p['lora_A'].astype(jnp.float32)
        w = (w.astype(jnp.float32)
             + jnp.float32(lora_config['alpha']) * delta).astype(w.dtype)
    N, K = w.shape
    w_t = jnp.transpose(w)                               # (K, N)
    Kp, Np = _round_up(K, 128), _round_up(N, 128)
    if (Kp, Np) != (K, N):
        w_t = jnp.pad(w_t, ((0, Kp - K), (0, Np - N)))
    return {'w_t': w_t, 'in_features': K, 'out_features': N}


def pallas_linear(x, prep, *, tm=512, tn=512, tk=1024, precision='fp32'):
    """CustomLinear.forward; the LoRA delta is already merged into prep['w_t']."""
    *lead, K = x.shape
    assert K == prep['in_features']
    w_t = prep['w_t']
    Kp, Np = w_t.shape
    N = prep['out_features']

    M = int(np.prod(lead)) if lead else 1
    x2 = x.reshape(M, K)

    tm = min(tm, _round_up(M, 8))
    tn = _pick_div(Np, tn, 128)
    tk = _pick_div(Kp, tk, 128)
    Mp = _round_up(M, tm)
    if (Mp, Kp) != (M, K):
        x2 = jnp.pad(x2, ((0, Mp - M), (0, Kp - K)))

    compute_dtype = jnp.bfloat16 if precision == 'bf16' else jnp.float32
    grid = (Mp // tm, Np // tn, Kp // tk)
    bytes_accessed = (x2.dtype.itemsize * Mp * Kp
                      + w_t.dtype.itemsize * Np * Kp
                      + x.dtype.itemsize * Mp * Np)

    out = pl.pallas_call(
        functools.partial(_matmul_kernel, compute_dtype),
        out_shape=jax.ShapeDtypeStruct((Mp, Np), x.dtype),
        grid_spec=pltpu.PrefetchScalarGridSpec(
            num_scalar_prefetch=0,
            grid=grid,
            in_specs=[
                pl.BlockSpec((tm, tk), lambda i, j, k: (i, k)),
                pl.BlockSpec((tk, tn), lambda i, j, k: (k, j)),
            ],
            out_specs=pl.BlockSpec((tm, tn), lambda i, j, k: (i, j)),
            scratch_shapes=[pltpu.VMEM((tm, tn), jnp.float32)],
        ),
        compiler_params=pltpu.CompilerParams(
            dimension_semantics=("parallel", "parallel", "arbitrary"),
            vmem_limit_bytes=32 * 1024 * 1024),
        cost_estimate=pl.CostEstimate(
            flops=2 * Mp * Np * Kp, transcendentals=0,
            bytes_accessed=bytes_accessed),
    )(x2, w_t)

    return out[:M, :N].reshape(*lead, N)


# ---------------------------------------------------------------------------
# Kernel 2: fused, query-tiled attention (RoPE + bias + softmax + weights@V)
# ---------------------------------------------------------------------------
def _attention_kernel(scale, tq, use_roll, compute_dtype, approx_recip, *refs):
    if use_roll:
        (q_ref, k_ref, v_ref, bias_ref, cos_ref, sin_ref,
         o_ref, w_ref, kr_ref) = refs
        rot_ref = None
    else:
        (q_ref, k_ref, v_ref, bias_ref, cos_ref, sin_ref, rot_ref,
         o_ref, w_ref, kr_ref) = refs

    d_half = q_ref.shape[-1] // 2
    qi = pl.program_id(1)

    def rope(x, cos, sin):
        # rotate_half(x) = [-x2, x1].  With use_roll the sign is folded into
        # the sin table and the lane rotation goes to the XLU; otherwise the
        # tiny (Dh, Dh) +/-1 matmul is used (sub-128 lane dims).
        if use_roll:
            rot_x = pltpu.roll(x, shift=d_half, axis=1)      # [x2, x1]
        else:
            rot_x = jnp.dot(x, rot_ref[...], preferred_element_type=jnp.float32)
        return x * cos + rot_x * sin

    # Rope K once per (batch*head); the VMEM scratch persists across q tiles
    # (the qi grid axis is "arbitrary", so it runs in order on one core).
    @pl.when(qi == 0)
    def _():
        kr_ref[...] = rope(k_ref[0].astype(jnp.float32),
                           cos_ref[...], sin_ref[...])

    if tq == cos_ref.shape[0]:
        cos_q, sin_q = cos_ref[...], sin_ref[...]
    else:
        row0 = pl.multiple_of(qi * tq, tq)
        cos_q = cos_ref[pl.ds(row0, tq), :]
        sin_q = sin_ref[pl.ds(row0, tq), :]

    q = q_ref[0].astype(jnp.float32)
    qr = rope(q, cos_q, sin_q) * scale            # fold scale into the q tile

    # bias is pre-scaled in the wrapper -> scores == (mask + q @ k^T) * scale.
    scores = bias_ref[0] + jax.lax.dot_general(
        qr.astype(compute_dtype), kr_ref[...].astype(compute_dtype),
        dimension_numbers=(((1,), (1,)), ((), ())),
        preferred_element_type=jnp.float32)

    m = jnp.max(scores, axis=-1, keepdims=True)
    e = jnp.exp(scores - m)
    w = e * pl.reciprocal(jnp.sum(e, axis=-1, keepdims=True), approx=approx_recip)

    o = jnp.dot(w.astype(compute_dtype), v_ref[0].astype(compute_dtype),
                preferred_element_type=jnp.float32)
    o_ref[0] = o.astype(o_ref.dtype)
    w_ref[0] = w.astype(w_ref.dtype)


def pallas_attention(q, k, v, bias, cos, sin, scale, *, n_heads,
                     tq=256, precision='fp32'):
    BH, S, Dh = q.shape
    if S <= tq or S % 8 != 0:
        tq = S
    else:
        tq = _pick_div(S, tq, 8)

    use_roll = (Dh % 128 == 0)
    compute_dtype = jnp.bfloat16 if precision == 'bf16' else jnp.float32
    approx_recip = (precision == 'bf16')

    if use_roll:
        # Fold the rotate-half sign into sin: rotate_half(x)*sin ==
        # roll(x, Dh//2)*sin_signed with sign = [-1]*Dh/2 ++ [+1]*Dh/2.
        sign = jnp.concatenate([-jnp.ones((Dh // 2,), jnp.float32),
                                jnp.ones((Dh // 2,), jnp.float32)])
        sin = sin * sign[None, :]
        extra_in, extra_specs = (), ()
    else:
        extra_in = (_rotate_half_matrix(Dh),)
        extra_specs = (pl.BlockSpec((Dh, Dh), lambda bh, qi: (0, 0)),)

    head_q_spec = pl.BlockSpec((1, tq, Dh), lambda bh, qi: (bh, qi, 0))
    kv_spec = pl.BlockSpec((1, S, Dh), lambda bh, qi: (bh, 0, 0))
    if bias.shape[0] == 1:
        bias_spec = pl.BlockSpec((1, tq, S), lambda bh, qi: (0, qi, 0))
    else:  # (B, S, S): heads of a batch are contiguous in the BH axis
        bias_spec = pl.BlockSpec((1, tq, S), lambda bh, qi: (bh // n_heads, qi, 0))
    tab_spec = pl.BlockSpec((S, Dh), lambda bh, qi: (0, 0))

    kernel = functools.partial(_attention_kernel, float(scale), tq, use_roll,
                               compute_dtype, approx_recip)

    bytes_accessed = (q.dtype.itemsize * 4 * BH * S * Dh                 # q,k,v,o
                      + bias.dtype.itemsize * bias.shape[0] * S * S      # bias
                      + 4 * BH * S * S)                                  # weights out

    return pl.pallas_call(
        kernel,
        out_shape=(jax.ShapeDtypeStruct((BH, S, Dh), q.dtype),
                   jax.ShapeDtypeStruct((BH, S, S), jnp.float32)),
        grid_spec=pltpu.PrefetchScalarGridSpec(
            num_scalar_prefetch=0,
            grid=(BH, S // tq),
            in_specs=[head_q_spec, kv_spec, kv_spec, bias_spec,
                      tab_spec, tab_spec, *extra_specs],
            out_specs=[head_q_spec,
                       pl.BlockSpec((1, tq, S), lambda bh, qi: (bh, qi, 0))],
            scratch_shapes=[pltpu.VMEM((S, Dh), jnp.float32)],
        ),
        compiler_params=pltpu.CompilerParams(
            # qi must run in order per (batch*head): the roped-K scratch is
            # filled at qi == 0 and reused by the remaining q tiles.
            dimension_semantics=("parallel", "arbitrary"),
            vmem_limit_bytes=32 * 1024 * 1024),
        cost_estimate=pl.CostEstimate(
            flops=4 * BH * S * S * Dh, transcendentals=BH * S * S,
            bytes_accessed=bytes_accessed),
    )(q, k, v, bias, cos, sin, *extra_in)


# ---------------------------------------------------------------------------
# Layout / RoPE helpers (glue, mirrors einops in the torch module exactly)
# ---------------------------------------------------------------------------
def _split_heads(t, n_heads):           # 'b s (d h) -> (b h) s d'
    B, S, DH = t.shape
    d = DH // n_heads
    t = t.reshape(B, S, d, n_heads)
    t = jnp.transpose(t, (0, 3, 1, 2))
    return t.reshape(B * n_heads, S, d)


def _merge_heads(t, batch, n_heads):    # '(b h) s d -> b s (d h)'
    BH, S, d = t.shape
    t = t.reshape(batch, n_heads, S, d)
    t = jnp.transpose(t, (0, 2, 3, 1))
    return t.reshape(batch, S, d * n_heads)


def _rope_tables(seq_len, dim, base=10000.0, dtype=jnp.float32):
    inv_freq = 1.0 / (base ** (jnp.arange(0, dim, 2, dtype=jnp.float32) / dim))
    pos = jnp.arange(seq_len, dtype=jnp.float32)
    freqs = jnp.outer(pos, inv_freq)
    emb = jnp.concatenate([freqs, freqs], axis=-1)
    return jnp.cos(emb).astype(dtype), jnp.sin(emb).astype(dtype)


def _rotate_half_matrix(d, dtype=jnp.float32):
    eye = jnp.eye(d // 2, dtype=dtype)
    zer = jnp.zeros((d // 2, d // 2), dtype=dtype)
    return jnp.block([[zer, eye], [-eye, zer]])


# ---------------------------------------------------------------------------
# MultiHeadAttention forward (Pallas) and a pure-JAX reference
# ---------------------------------------------------------------------------
def prepare_mha_params(params, lora_config=None):
    """One-time parameter prep: LoRA merge + weight transpose / padding."""
    return {'to_qkv': prepare_linear_params(params['to_qkv'], lora_config),
            'to_out': prepare_linear_params(params['to_out'], lora_config)}


def mha_forward_pallas(hidden_states, attn_mask, prep, n_heads,
                       pad_mask=None, precision='fp32'):
    B, S, _ = hidden_states.shape

    qkv = pallas_linear(hidden_states, prep['to_qkv'], precision=precision)
    qkv_dim = qkv.shape[-1] // 3
    q, k, v = jnp.split(qkv, 3, axis=-1)
    q, k, v = (_split_heads(t, n_heads) for t in (q, k, v))
    head_dim = qkv_dim // n_heads
    scale = head_dim ** (-0.5)

    # Bias stays un-broadcast over heads ((1,S,S) or (B,S,S)); the kernel's
    # index_map reuses it across the heads of a batch.  Pre-scaled once so the
    # kernel never scales the (tq, S) scores tile.
    bias = attn_mask[None, :, :]
    if pad_mask is not None:
        bias = bias + pad_mask[:, None, :]
    bias = (bias * scale).astype(jnp.float32)

    present = (k, v)                                   # un-roped, as in torch
    cos, sin = _rope_tables(S, head_dim)

    attn_out, attn_w = pallas_attention(q, k, v, bias, cos, sin, scale,
                                        n_heads=n_heads, precision=precision)
    attn_out = _merge_heads(attn_out, B, n_heads)
    attn_out = pallas_linear(attn_out, prep['to_out'], precision=precision)
    attn_w = attn_w.reshape(B, n_heads, S, S)
    return attn_out, attn_w, present


def _ref_linear(x, p, lora_config=None):
    out = jnp.einsum('...k,nk->...n', x, p['weight'])
    if lora_config is not None and 'lora_A' in p:
        lw = p['lora_B'] @ p['lora_A']
        out = out + lora_config['alpha'] * jnp.einsum('...k,nk->...n', x, lw)
    return out


def mha_forward_ref(hidden_states, attn_mask, params, n_heads,
                    pad_mask=None, lora_config=None):
    B, S, _ = hidden_states.shape
    qkv = _ref_linear(hidden_states, params['to_qkv'], lora_config)
    qkv_dim = qkv.shape[-1] // 3
    q, k, v = jnp.split(qkv, 3, axis=-1)
    q, k, v = (_split_heads(t, n_heads) for t in (q, k, v))
    head_dim = qkv_dim // n_heads
    scale = head_dim ** (-0.5)

    bias = attn_mask[None, :, :]
    if pad_mask is not None:
        bias = bias + pad_mask[:, None, :]
    bias = jnp.broadcast_to(bias, (B, S, S))
    bias = jnp.repeat(bias, n_heads, axis=0)

    present = (k, v)
    cos, sin = _rope_tables(S, head_dim)

    def rope(t):
        d = t.shape[-1]
        t1, t2 = t[..., :d // 2], t[..., d // 2:]
        return t * cos + jnp.concatenate([-t2, t1], axis=-1) * sin

    qr, kr = rope(q), rope(k)
    scores = (bias + jnp.einsum('bqd,bkd->bqk', qr, kr)) * scale
    w = jax.nn.softmax(scores, axis=-1)
    o = jnp.einsum('bqk,bkd->bqd', w, v)
    o = _merge_heads(o, B, n_heads)
    o = _ref_linear(o, params['to_out'], lora_config)
    return o, w.reshape(B, n_heads, S, S), present


# ---------------------------------------------------------------------------
# Deterministic init (mirrors nn.init.kaiming_uniform_(a=sqrt(5)))
# ---------------------------------------------------------------------------
def kaiming_uniform(key, shape, fan_in, a=math.sqrt(5), dtype=jnp.float32):
    gain = math.sqrt(2.0 / (1.0 + a * a))
    bound = gain * math.sqrt(3.0 / fan_in)
    return jax.random.uniform(key, shape, dtype=dtype, minval=-bound, maxval=bound)


if __name__ == "__main__":
    key = jax.random.PRNGKey(0)
    ks = jax.random.split(key, 8)

    B, S, hidden_dim, qkv_dim, n_heads = 2, 8, 32, 32, 4

    x = jax.random.normal(ks[0], (B, S, hidden_dim), dtype=jnp.float32)
    # Float causal attention mask (0 on/below diagonal, large negative above).
    causal = jnp.where(jnp.tril(jnp.ones((S, S), dtype=bool)),
                       0.0, -1e9).astype(jnp.float32)

    # --- pretraining mode (lora disabled) --------------------------------
    params = {
        'to_qkv': {'weight': kaiming_uniform(ks[1], (3 * qkv_dim, hidden_dim),
                                             fan_in=hidden_dim)},
        'to_out': {'weight': kaiming_uniform(ks[2], (hidden_dim, qkv_dim),
                                             fan_in=qkv_dim)},
    }
    prep = prepare_mha_params(params)             # one-time weight prep
    out, w, (pk, pv) = mha_forward_pallas(x, causal, prep, n_heads)
    r_out, r_w, (rk, rv) = mha_forward_ref(x, causal, params, n_heads)
    np.testing.assert_allclose(np.asarray(out), np.asarray(r_out), rtol=2e-5, atol=2e-5)
    np.testing.assert_allclose(np.asarray(w), np.asarray(r_w), rtol=2e-5, atol=2e-5)
    np.testing.assert_allclose(np.asarray(pk), np.asarray(rk), rtol=2e-5, atol=2e-5)
    np.testing.assert_allclose(np.asarray(pv), np.asarray(rv), rtol=2e-5, atol=2e-5)

    # --- pretraining mode with padding mask (exercises the (B,S,S) bias) --
    pad = jnp.zeros((B, S), jnp.float32).at[1, -1].set(-1e9)
    out_p, w_p, _ = mha_forward_pallas(x, causal, prep, n_heads, pad_mask=pad)
    r_out_p, r_w_p, _ = mha_forward_ref(x, causal, params, n_heads, pad_mask=pad)
    np.testing.assert_allclose(np.asarray(out_p), np.asarray(r_out_p),
                               rtol=2e-5, atol=2e-5)
    np.testing.assert_allclose(np.asarray(w_p), np.asarray(r_w_p),
                               rtol=2e-5, atol=2e-5)

    # --- lora-finetuning mode (delta merged once in prepare_mha_params) ---
    rank, alpha = 4, 2.0
    lora_cfg = {'rank': rank, 'alpha': alpha}
    params_l = {
        'to_qkv': {'weight': params['to_qkv']['weight'],
                   'lora_A': kaiming_uniform(ks[3], (rank, hidden_dim),
                                             fan_in=hidden_dim),
                   'lora_B': 0.05 * jax.random.normal(
                       ks[4], (3 * qkv_dim, rank), dtype=jnp.float32)},
        'to_out': {'weight': params['to_out']['weight'],
                   'lora_A': kaiming_uniform(ks[5], (rank, qkv_dim),
                                             fan_in=qkv_dim),
                   'lora_B': jnp.zeros((hidden_dim, rank), jnp.float32)},
    }
    prep_l = prepare_mha_params(params_l, lora_cfg)
    out_l, w_l, _ = mha_forward_pallas(x, causal, prep_l, n_heads)
    r_out_l, r_w_l, _ = mha_forward_ref(x, causal, params_l, n_heads,
                                        lora_config=lora_cfg)
    np.testing.assert_allclose(np.asarray(out_l), np.asarray(r_out_l),
                               rtol=2e-5, atol=2e-5)
    np.testing.assert_allclose(np.asarray(w_l), np.asarray(r_w_l),
                               rtol=2e-5, atol=2e-5)

    jax.block_until_ready(out_l)
    print("KERNEL_OK")
</pallas_src>

<mosaic_0001>
module attributes {stable_mosaic.version = 11 : i64} {
  func.func @_matmul_kernel(%arg0: i32, %arg1: i32, %arg2: i32, %arg3: memref<16x128xf32, #tpu.memory_space<vmem>>, %arg4: memref<128x128xf32, #tpu.memory_space<vmem>>, %arg5: memref<16x128xf32, #tpu.memory_space<vmem>>, %arg6: memref<16x128xf32, #tpu.memory_space<vmem>>) attributes {dimension_semantics = [#tpu.dimension_semantics<parallel>, #tpu.dimension_semantics<parallel>, #tpu.dimension_semantics<arbitrary>], iteration_bounds = array<i64: 1, 1, 1>, scalar_prefetch = 0 : i64, scratch_operands = 1 : i64, tpu.core_type = #tpu.core_type<tc>, window_params = [{transform_indices = @transform_0, window_bounds = array<i64: 16, 128>}, {transform_indices = @transform_1, window_bounds = array<i64: 128, 128>}, {transform_indices = @transform_2, window_bounds = array<i64: 16, 128>}]} {
    %c0_i32 = arith.constant 0 : i32
    %0 = arith.cmpi eq, %arg2, %c0_i32 : i32
    %1 = arith.extui %0 : i1 to i32
    %c0_i32_0 = arith.constant 0 : i32
    %2 = arith.cmpi ne, %1, %c0_i32_0 : i32
    scf.if %2 {
      %cst_10 = arith.constant 0.000000e+00 : f32
      %12 = vector.broadcast %cst_10 : f32 to vector<16x128xf32>
      %c0_11 = arith.constant 0 : index
      %c0_12 = arith.constant 0 : index
      %13 = vector.load %arg6[%c0_11, %c0_12] : memref<16x128xf32, #tpu.memory_space<vmem>>, vector<16x128xf32>
      tpu.vector_store %arg6[%c0_11, %c0_12], %12 {strides = array<i32>} : memref<16x128xf32, #tpu.memory_space<vmem>>, vector<16x128xf32>,
    } else {
    }
    %c0 = arith.constant 0 : index
    %c0_1 = arith.constant 0 : index
    %3 = vector.load %arg6[%c0, %c0_1] : memref<16x128xf32, #tpu.memory_space<vmem>>, vector<16x128xf32>
    %c0_2 = arith.constant 0 : index
    %c0_3 = arith.constant 0 : index
    %4 = vector.load %arg3[%c0_2, %c0_3] : memref<16x128xf32, #tpu.memory_space<vmem>>, vector<16x128xf32>
    %c0_4 = arith.constant 0 : index
    %c0_5 = arith.constant 0 : index
    %5 = vector.load %arg4[%c0_4, %c0_5] : memref<128x128xf32, #tpu.memory_space<vmem>>, vector<128x128xf32>
    %cst = arith.constant dense<0.000000e+00> : vector<16x128xf32>
    %6 = tpu.matmul %4, %5, %cst {dimension_numbers = #tpu.dot_dimension_numbers<[1], [0], [0], [1], [0, 0, 1, 1], [], []>} : vector<16x128xf32>, vector<128x128xf32>, vector<16x128xf32> -> vector<16x128xf32>
    %7 = arith.addf %3, %6 : vector<16x128xf32>
    %c0_6 = arith.constant 0 : index
    %c0_7 = arith.constant 0 : index
    %8 = vector.load %arg6[%c0_6, %c0_7] : memref<16x128xf32, #tpu.memory_space<vmem>>, vector<16x128xf32>
    tpu.vector_store %arg6[%c0_6, %c0_7], %7 {strides = array<i32>} : memref<16x128xf32, #tpu.memory_space<vmem>>, vector<16x128xf32>,
    %c0_i32_8 = arith.constant 0 : i32
    %9 = arith.cmpi eq, %arg2, %c0_i32_8 : i32
    %10 = arith.extui %9 : i1 to i32
    %c0_i32_9 = arith.constant 0 : i32
    %11 = arith.cmpi ne, %10, %c0_i32_9 : i32
    scf.if %11 {
      %c0_10 = arith.constant 0 : index
      %c0_11 = arith.constant 0 : index
      %12 = vector.load %arg6[%c0_10, %c0_11] : memref<16x128xf32, #tpu.memory_space<vmem>>, vector<16x128xf32>
      %c0_12 = arith.constant 0 : index
      %c0_13 = arith.constant 0 : index
      %13 = vector.load %arg5[%c0_12, %c0_13] : memref<16x128xf32, #tpu.memory_space<vmem>>, vector<16x128xf32>
      tpu.vector_store %arg5[%c0_12, %c0_13], %12 {strides = array<i32>} : memref<16x128xf32, #tpu.memory_space<vmem>>, vector<16x128xf32>,
    } else {
    }
    return
  }
  func.func @transform_0(%arg0: i32, %arg1: i32, %arg2: i32) -> (i32, i32) {
    %c0_i32 = arith.constant 0 : i32
    return %arg0, %arg2 : i32, i32
  }
  func.func @transform_1(%arg0: i32, %arg1: i32, %arg2: i32) -> (i32, i32) {
    %c0_i32 = arith.constant 0 : i32
    return %arg2, %arg1 : i32, i32
  }
  func.func @transform_2(%arg0: i32, %arg1: i32, %arg2: i32) -> (i32, i32) {
    %c0_i32 = arith.constant 0 : i32
    return %arg0, %arg1 : i32, i32
  }
}

</mosaic_0001>

<bundles_post_ra>
// kernel: tpu_custom_call.1
= control target key start
LH: loop header
LB: loop body
LE: loop exit
PB: predicated region body
PF: predicated region fallthrough
CT: control target
= control target key end

     0   :  { %7 = vsyncpa [#allocation4], 0  ;;  %s332_s0 = inlined_call_operand.hbm [shape: f32[16,128], index: 0, kind: input, shape index: {}]   ;;  %s333_s1 = inlined_call_operand.hbm [shape: f32[128,128], index: 1, kind: input, shape index: {}]   ;;  %s334_s2 = inlined_call_operand.hbm [shape: f32[16,128], index: 2, kind: output, shape index: {}]  }
   0x1   :  { %8 = vsyncpa [#allocation7], 0 }
   0x2   :  { %9 = vsyncpa [#allocation5], 0  ;;  %s294_s9 = smov [#allocation3]  }
   0x3   :  { %s15_s10 = sshll.u32 %s294_s9, 4  ;;  %s16_s10 = int_to_ptr.vmem [resolvable:$true] %s15_s10 }
   0x4   :  { %s236_s11 = scalar_lea.vmem %s16_s10, 256  ;;  %p241_p1 = scmp.lt.s32.totalorder %s16_s10, %s16_s10 }
   0x5   :  { %p237_p0 = scmp.ne.s32.totalorder %s16_s10, %s236_s11  ;;  %p242_p2 = scmp.lt.s32.totalorder %s236_s11, %s236_s11 }
   0x7   :  { %p243_p3 = por %p242_p2, %p241_p1 }
   0x9   :  { %p244_p4 = pnand %p243_p3, %p237_p0 }
   0xb   :  { %247 = shalt.err (!%p244_p4)
}
   0xc   :  { %s295_s12 = smov 128   ;;  %s296_s13 = smov 8  }
   0xd   :  { %21 = dma.hbm_to_vmem [thread:$0]  %s332_s0, 256, %s16_s10, [#allocation4], %s295_s12, %s295_s12, %s296_s13  }
   0xe   :  { %s297_s16 = smov [#allocation6]  }
   0xf   :  { %s27_s17 = sshll.u32 %s297_s16, 4  ;;  %s28_s17 = int_to_ptr.vmem [resolvable:$true] %s27_s17 }
  0x10   :  { %s256_s18 = scalar_lea.vmem %s28_s17, 2048  ;;  %p261_p6 = scmp.lt.s32.totalorder %s28_s17, %s28_s17 }
  0x11   :  { %p257_p5 = scmp.ne.s32.totalorder %s28_s17, %s256_s18  ;;  %p262_p7 = scmp.lt.s32.totalorder %s256_s18, %s256_s18 }
  0x13   :  { %p263_p8 = por %p262_p7, %p261_p6 }
  0x15   :  { %p264_p9 = pnand %p263_p8, %p257_p5 }
  0x17   :  { %267 = shalt.err (!%p264_p9)
}
  0x18   :  { %33 = dma.hbm_to_vmem [thread:$0]  %s333_s1, 2048, %s28_s17, [#allocation7], %s295_s12, %s295_s12, %s296_s13  }
  0x19   :  { %288 = dma.done.wait [#allocation4], 256  }
  0x1a   :  { %289 = vsyncadd [#allocation4], 4294967040 }
  0x1b   :  { %290 = dma.done.wait [#allocation7], 2048  }
  0x1c   :  { %291 = vsyncadd [#allocation7], 4294965248  ;;  %v65_v0 = vld [vmem:[#allocation6 + $0x78] sm:$0xff]  ;;  %v64_v1 = vld [vmem:[#allocation6 + $0x70] sm:$0xff]  ;;  %s298_s0 = smov [#allocation8]  }
  0x1d   :  { %188 = vmatprep.subr.mxu0 %v65_v0  ;;  %v63_v2 = vld [vmem:[#allocation6 + $0x68] sm:$0xff]  ;;  %v62_v3 = vld [vmem:[#allocation6 + $0x60] sm:$0xff]  ;;  %v48_v4 = vld [vmem:[#allocation3] sm:$0xff]  ;;  %s157_s1 = sshll.u32 %s298_s0, 4  ;;  %s158_s1 = int_to_ptr.vmem [resolvable:$true] %s157_s1 }
  0x1e   :  { %189 = vmatpush3.msra.mxu0 %v65_v0  ;;  %v61_v5 = vld [vmem:[#allocation6 + $0x58] sm:$0xff]  ;;  %220 = vmatprep.mubr.f32.mxu0 %v48_v4  ;;  %v60_v6 = vld [vmem:[#allocation6 + $0x50] sm:$0xff]  ;;  %v59_v7 = vld [vmem:[#allocation6 + $0x48] sm:$0xff]  ;;  %s268_s21 = scalar_lea.vmem %s158_s1, 256  ;;  %p273_p11 = scmp.lt.s32.totalorder %s158_s1, %s158_s1 }
  0x1f   :  { %190 = vmatprep.subr.mxu0 %v64_v1  ;;  %v58_v8 = vld [vmem:[#allocation6 + $0x40] sm:$0xff]  ;;  %v57_v9 = vld [vmem:[#allocation6 + $0x38] sm:$0xff]  ;;  %v56_v10 = vld [vmem:[#allocation6 + $0x30] sm:$0xff]  ;;  %p269_p10 = scmp.ne.s32.totalorder %s158_s1, %s268_s21  ;;  %p274_p12 = scmp.lt.s32.totalorder %s268_s21, %s268_s21 }
  0x20   :  { %191 = vmatpush3.msra.mxu0 %v64_v1  ;;  %v55_v11 = vld [vmem:[#allocation6 + $0x28] sm:$0xff]  ;;  %v54_v12 = vld [vmem:[#allocation6 + $0x20] sm:$0xff]  ;;  %v53_v13 = vld [vmem:[#allocation6 + $0x18] sm:$0xff] }
  0x21   :  { %192 = vmatprep.subr.mxu0 %v63_v2  ;;  %v52_v14 = vld [vmem:[#allocation6 + $0x10] sm:$0xff]  ;;  %v51_v15 = vld [vmem:[#allocation6 + $0x8] sm:$0xff]  ;;  %v50_v16 = vld [vmem:[#allocation6] sm:$0xff]  ;;  %p275_p13 = por %p274_p12, %p273_p11 }
  0x22   :  { %193 = vmatpush3.msra.mxu0 %v63_v2  ;;  %v49_v17 = vld [vmem:[#allocation3 + $0x8] sm:$0xff] }
  0x23   :  { %194 = vmatprep.subr.mxu0 %v62_v3  ;;  %p276_p0 = pnand %p275_p13, %p269_p10 }
  0x24   :  { %195 = vmatpush3.msra.mxu0 %v62_v3 }
  0x25   :  { %196 = vmatprep.subr.mxu0 %v61_v5 }
  0x26   :  { %197 = vmatpush3.msra.mxu0 %v61_v5 }
  0x27   :  { %198 = vmatprep.subr.mxu0 %v60_v6 }
  0x28   :  { %199 = vmatpush3.msra.mxu0 %v60_v6 }
  0x29   :  { %200 = vmatprep.subr.mxu0 %v59_v7 }
  0x2a   :  { %201 = vmatpush3.msra.mxu0 %v59_v7 }
  0x2b   :  { %202 = vmatprep.subr.mxu0 %v58_v8 }
  0x2c   :  { %203 = vmatpush3.msra.mxu0 %v58_v8 }
  0x2d   :  { %204 = vmatprep.subr.mxu0 %v57_v9 }
  0x2e   :  { %205 = vmatpush3.msra.mxu0 %v57_v9 }
  0x2f   :  { %206 = vmatprep.subr.mxu0 %v56_v10 }
  0x30   :  { %207 = vmatpush3.msra.mxu0 %v56_v10 }
  0x31   :  { %208 = vmatprep.subr.mxu0 %v55_v11 }
  0x32   :  { %209 = vmatpush3.msra.mxu0 %v55_v11 }
  0x33   :  { %210 = vmatprep.subr.mxu0 %v54_v12 }
  0x34   :  { %211 = vmatpush3.msra.mxu0 %v54_v12 }
  0x35   :  { %212 = vmatprep.subr.mxu0 %v53_v13 }
  0x36   :  { %213 = vmatpush3.msra.mxu0 %v53_v13 }
  0x37   :  { %214 = vmatprep.subr.mxu0 %v52_v14 }
  0x38   :  { %215 = vmatpush3.msra.mxu0 %v52_v14 }
  0x39   :  { %216 = vmatprep.subr.mxu0 %v51_v15 }
  0x3a   :  { %217 = vmatpush3.msra.mxu0 %v51_v15 }
  0x3b   :  { %218 = vmatprep.subr.mxu0 %v50_v16 }
  0x3c   :  { %219 = vmatpush3.msra.mxu0 %v50_v16 }
  0x3d   :  { %221 = vmatmul.mubr.f32.vlgmr.msra.gmra.mxu0 %v49_v17 }
  0xfd   :  { %v222_v18 = vpop.f32.mrf.mxu0 }
  0xfe   :  { %151 = vst [vmem:[#allocation8 + $0x8] sm:$0xff] %v222_v18 }
  0xff   :  { %v132_v19 = vpop.f32.mrf.mxu0 }
 0x100   :  { %150 = vst [vmem:[#allocation8] sm:$0xff] %v132_v19 }
 0x101   :  { %279 = shalt.err (!%p276_p0)
}
 0x102   :  { %163 = dma.vmem_to_hbm [thread:$0]  %s158_s1, 256, %s334_s2, [#allocation5], %s295_s12, %s295_s12, %s296_s13  }
 0x103   :  { %292 = dma.done.wait [#allocation5], 256  }
 0x104   :  { %293 = vsyncadd [#allocation5], 4294967040 }
 0x105   :  { %167 = vsyncpa [#allocation4], 1 }
 0x106   :  { %168 = vsyncpa [#allocation7], 1 }
 0x107   :  { %169 = vsyncpa [#allocation5], 1 }

</bundles_post_ra>
